<compile_context>
chip_gen: v5e
topology: v5e:2x2
jax: 0.10.0
libtpu: 0.0.40
codegen_flags: <defaults>
</compile_context>

<pallas_src>
import functools
import math

import jax
import jax.numpy as jnp
from jax.experimental import pallas as pl
from jax.experimental.pallas import tpu as pltpu


def _round_up(x, m):
    return ((x + m - 1) // m) * m


def _largest_tile(total, cap):
    """Largest multiple of 128 that divides `total` (itself a 128-multiple), <= cap."""
    t = max(128, min(cap, total))
    t = (t // 128) * 128
    while total % t:
        t -= 128
    return t


@functools.cache
def _device_budget():
    """Per-generation tile / VMEM budgets."""
    try:
        kind = jax.devices()[0].device_kind.lower()
    except Exception:  # pragma: no cover - fall back to the conservative budget
        kind = ""
    if "v7" in kind:
        # 64 MiB physical / 32 MiB scoped VMEM, 2 TensorCores per chip.
        return dict(tm=256, tn=512, tk=512, vmem_limit=32 << 20,
                    tile_budget=20 << 20, ncores=2)
    # v5e / v6e: 128 MiB physical VMEM, 1 TensorCore.
    return dict(tm=512, tn=512, tk=1024, vmem_limit=64 << 20,
                tile_budget=44 << 20, ncores=1)


# ----------------------------------------------------------------------------
# Kernels
# ----------------------------------------------------------------------------
def _linear_kernel_single(x_ref, w_ref, b_ref, o_ref):
    # Whole (pre-padded) problem resident in VMEM: one MXU pass + VPU bias add.
    acc = jnp.dot(x_ref[...], w_ref[...], preferred_element_type=jnp.float32)
    o_ref[...] = (acc + b_ref[...]).astype(o_ref.dtype)


def _linear_kernel_tiled(x_ref, w_ref, b_ref, o_ref):
    # grid = (M/tm, N/tn, K/tk); K is the innermost ("arbitrary") reduction axis.
    # The f32 output block stays resident in VMEM across K, so accumulate
    # directly into o_ref (no scratch accumulator, no finalize copy).
    k = pl.program_id(2)
    partial = jnp.dot(x_ref[...], w_ref[...], preferred_element_type=jnp.float32)

    @pl.when(k == 0)
    def _init():
        o_ref[...] = partial + b_ref[...]      # bias added exactly once

    @pl.when(k > 0)
    def _accum():
        o_ref[...] += partial


# ----------------------------------------------------------------------------
# Parameter preparation (outside the hot path)
# ----------------------------------------------------------------------------
def prepare_linear_params(weight_t, bias, *, use_bf16=False):
    """Pad (and optionally cast) the parameters once, outside the per-call path.

    weight_t: [Din, Dout] float32 (transpose of PyTorch's fc.weight)
    bias:     [Dout]      float32
    Returns (w_prepared [Kp, Np], b_prepared [1, Np], out_dim).
    """
    Din, Dout = weight_t.shape
    Kp, Np = _round_up(Din, 128), _round_up(Dout, 128)
    w_dtype = jnp.bfloat16 if use_bf16 else weight_t.dtype
    w = weight_t.astype(w_dtype)
    if (Kp, Np) != (Din, Dout):
        w = jnp.zeros((Kp, Np), w_dtype).at[:Din, :Dout].set(w)
    b = bias.astype(jnp.float32)
    if Np != Dout:
        b = jnp.zeros((Np,), jnp.float32).at[:Dout].set(b)
    return w, b.reshape(1, Np), Dout


# ----------------------------------------------------------------------------
# Wrapper
# ----------------------------------------------------------------------------
def linear_pallas(x, w_prepared, b_prepared, out_dim=None, *, use_bf16=False):
    """y = x @ W_t + b computed in a Pallas TPU kernel.

    x:          [B, Din]   float32 (cast to bf16 in-wrapper when use_bf16)
    w_prepared: [Kp, Np]   from prepare_linear_params (128-aligned, maybe bf16)
    b_prepared: [1, Np]    float32
    returns:    [B, out_dim] float32
    """
    if out_dim is None:
        out_dim = b_prepared.shape[-1]
    B, Din = x.shape
    Kp, Np = w_prepared.shape
    assert Kp >= Din and b_prepared.shape == (1, Np)

    budget = _device_budget()
    in_dtype = jnp.bfloat16 if use_bf16 else x.dtype
    sub = 16 if in_dtype == jnp.bfloat16 else 8          # sublane pack
    if x.dtype != in_dtype:
        x = x.astype(in_dtype)
    itemsize = jnp.dtype(in_dtype).itemsize

    # ---------- single-block (gridless) fast path for tiny problems ----------
    Bp = _round_up(B, sub)
    single_bytes = itemsize * (Bp * Kp + Kp * Np) + 4 * (Np + Bp * Np)
    if single_bytes <= (2 << 20):
        xp = x
        if (Bp, Kp) != (B, Din):                          # no-op when aligned
            xp = jnp.zeros((Bp, Kp), in_dtype).at[:B, :Din].set(x)
        out = pl.pallas_call(
            _linear_kernel_single,
            out_shape=jax.ShapeDtypeStruct((Bp, Np), jnp.float32),
            in_specs=[pl.BlockSpec(memory_space=pltpu.MemorySpace.VMEM)] * 3,
            out_specs=pl.BlockSpec(memory_space=pltpu.MemorySpace.VMEM),
        )(xp, w_prepared, b_prepared)
        if (Bp, Np) != (B, out_dim):
            out = out[:B, :out_dim]
        return out

    # ---------- tiled, pipelined path ----------------------------------------
    # tm shrinks to the (padded) batch when small (weight-bandwidth-bound regime);
    # tn/tk are 128-multiples that divide Np/Kp, so the pre-padded weight is
    # never re-padded or copied in the hot path.
    if B <= budget["tm"]:
        tm = _round_up(B, sub)
    else:
        tm = budget["tm"]
    Bp = _round_up(B, tm)
    tn = _largest_tile(Np, budget["tn"])
    tk = _largest_tile(Kp, budget["tk"])

    # v7x: make sure at least one parallel axis has >=2 blocks so the
    # ("parallel","parallel","arbitrary") semantics can use both TensorCores.
    if budget["ncores"] >= 2 and Bp // tm == 1 and Np // tn == 1 and Np >= 256:
        tn = _largest_tile(Np, Np // 2)

    # Keep the double-buffered tile footprint within the per-generation budget.
    def _footprint(tn_, tk_):
        return itemsize * 2 * (tm * tk_ + tk_ * tn_) + 4 * (2 * tm * tn_ + 2 * tn_)

    while _footprint(tn, tk) > budget["tile_budget"] and tk > 128:
        tk = _largest_tile(Kp, tk - 128)
    while _footprint(tn, tk) > budget["tile_budget"] and tn > 128:
        tn = _largest_tile(Np, tn - 128)

    xp = x
    if (Bp, Kp) != (B, Din):                              # no-op when aligned
        xp = jnp.zeros((Bp, Kp), in_dtype).at[:B, :Din].set(x)

    gm, gn, gk = Bp // tm, Np // tn, Kp // tk

    # TODO(synk): on v7x, if the weight stream is still exposed after the tile
    # bump, sweep pipeline_mode=pl.Buffered(3) on the weight BlockSpec.
    out = pl.pallas_call(
        _linear_kernel_tiled,
        out_shape=jax.ShapeDtypeStruct((Bp, Np), jnp.float32),
        grid=(gm, gn, gk),
        in_specs=[
            pl.BlockSpec((tm, tk), lambda i, j, k: (i, k)),
            pl.BlockSpec((tk, tn), lambda i, j, k: (k, j)),
            pl.BlockSpec((1, tn), lambda i, j, k: (0, j)),
        ],
        out_specs=pl.BlockSpec((tm, tn), lambda i, j, k: (i, j)),
        compiler_params=pltpu.CompilerParams(
            dimension_semantics=("parallel", "parallel", "arbitrary"),
            vmem_limit_bytes=budget["vmem_limit"],
        ),
        cost_estimate=pl.CostEstimate(
            flops=2 * Bp * Np * Kp,
            transcendentals=0,
            # x is re-read gn times, w is re-read gm times in this blocking.
            bytes_accessed=(itemsize * (Bp * Kp * gn + Kp * Np * gm)
                            + 4 * (Bp * Np + Np * gm)),
        ),
    )(xp, w_prepared, b_prepared)

    if (Bp, Np) != (B, out_dim):
        out = out[:B, :out_dim]
    return out


# ----------------------------------------------------------------------------
# Init mimicking PyTorch nn.Linear defaults
# ----------------------------------------------------------------------------
def init_simple_model_params(key, input_dim, output_dim):
    """Uniform +-1/sqrt(fan_in), weight stored transposed as [Din, Dout]."""
    k_w, k_b = jax.random.split(key)
    bound = 1.0 / math.sqrt(input_dim)
    weight_t = jax.random.uniform(
        k_w, (input_dim, output_dim), dtype=jnp.float32, minval=-bound, maxval=bound
    )
    bias = jax.random.uniform(
        k_b, (output_dim,), dtype=jnp.float32, minval=-bound, maxval=bound
    )
    return weight_t, bias


if __name__ == "__main__":
    key = jax.random.PRNGKey(0)
    k_x, k_p = jax.random.split(key)

    batch = 8
    input_dim = 32
    output_dim = 16

    x = jax.random.normal(k_x, (batch, input_dim), dtype=jnp.float32)
    weight_t, bias = init_simple_model_params(k_p, input_dim, output_dim)

    # One-time parameter preparation (padding / optional bf16 cast) outside jit.
    w_prep, b_prep, out_dim = prepare_linear_params(weight_t, bias, use_bf16=False)

    linear_jit = jax.jit(
        linear_pallas, static_argnums=(3,), static_argnames=("use_bf16",)
    )
    y = linear_jit(x, w_prep, b_prep, out_dim)
    y = jax.block_until_ready(y)

    # Sanity check against plain JAX reference.
    y_ref = x @ weight_t + bias
    assert y.shape == (batch, output_dim)
    assert jnp.allclose(y, y_ref, atol=1e-5, rtol=1e-5)

    print("KERNEL_OK")
</pallas_src>

<mosaic_0001>
module attributes {stable_mosaic.version = 11 : i64} {
  func.func @_linear_kernel_single(%arg0: memref<8x128xf32, #tpu.memory_space<vmem>>, %arg1: memref<128x128xf32, #tpu.memory_space<vmem>>, %arg2: memref<1x128xf32, #tpu.memory_space<vmem>>, %arg3: memref<8x128xf32, #tpu.memory_space<vmem>>) attributes {dimension_semantics = [], scalar_prefetch = 0 : i64, scratch_operands = 0 : i64, tpu.core_type = #tpu.core_type<tc>} {
    %c0 = arith.constant 0 : index
    %c0_0 = arith.constant 0 : index
    %0 = vector.load %arg0[%c0, %c0_0] : memref<8x128xf32, #tpu.memory_space<vmem>>, vector<8x128xf32>
    %c0_1 = arith.constant 0 : index
    %c0_2 = arith.constant 0 : index
    %1 = vector.load %arg1[%c0_1, %c0_2] : memref<128x128xf32, #tpu.memory_space<vmem>>, vector<128x128xf32>
    %cst = arith.constant dense<0.000000e+00> : vector<8x128xf32>
    %2 = tpu.matmul %0, %1, %cst {dimension_numbers = #tpu.dot_dimension_numbers<[1], [0], [0], [1], [0, 0, 1, 1], [], []>} : vector<8x128xf32>, vector<128x128xf32>, vector<8x128xf32> -> vector<8x128xf32>
    %c0_3 = arith.constant 0 : index
    %c0_4 = arith.constant 0 : index
    %3 = vector.load %arg2[%c0_3, %c0_4] : memref<1x128xf32, #tpu.memory_space<vmem>>, vector<1x128xf32>
    %4 = vector.broadcast %3 : vector<1x128xf32> to vector<8x128xf32>
    %5 = arith.addf %2, %4 : vector<8x128xf32>
    %c0_5 = arith.constant 0 : index
    %c0_6 = arith.constant 0 : index
    %6 = vector.load %arg3[%c0_5, %c0_6] : memref<8x128xf32, #tpu.memory_space<vmem>>, vector<8x128xf32>
    tpu.vector_store %arg3[%c0_5, %c0_6], %5 {strides = array<i32>} : memref<8x128xf32, #tpu.memory_space<vmem>>, vector<8x128xf32>,
    return
  }
}

</mosaic_0001>

<bundles_post_ra>
// kernel: linear_pallas.1
= control target key start
LH: loop header
LB: loop body
LE: loop exit
PB: predicated region body
PF: predicated region fallthrough
CT: control target
= control target key end

     0   :  { %8 = vsyncpa [#allocation3], 0  ;;  %s183_s0 = inlined_call_operand.vmem [shape: f32[8,128], index: 0, kind: input, shape index: {}]   ;;  %s184_s1 = inlined_call_operand.hbm [shape: f32[128,128], index: 1, kind: input, shape index: {}]   ;;  %s185_s2 = inlined_call_operand.vmem [shape: f32[1,128], index: 2, kind: input, shape index: {}]   ;;  %s186_s3 = inlined_call_operand.hbm [shape: f32[8,128], index: 3, kind: output, shape index: {}]  }
   0x1   :  { %9 = vsyncpa [#allocation4], 0  ;;  %s16_s14 = sshll.u32 %s184_s1, 4  ;;  %s147_s15 = smov [#allocation2]   ;;  %s17_s14 = int_to_ptr.hbm [resolvable:$true] %s16_s14 }
   0x2   :  { %s18_s16 = sshll.u32 %s147_s15, 4  ;;  %s148_s17 = smov 128   ;;  %s19_s16 = int_to_ptr.vmem [resolvable:$true] %s18_s16 }
   0x3   :  { %s149_s18 = smov 8  }
   0x4   :  { %24 = dma.hbm_to_vmem [thread:$0]  %s17_s14, 2048, %s19_s16, [#allocation3], %s148_s17, %s148_s17, %s149_s18  }
   0x5   :  { %143 = dma.done.wait [#allocation3], 2048  }
   0x6   :  { %144 = vsyncadd [#allocation3], 4294965248  ;;  %v47_v0 = vld [vmem:[#allocation2 + $0x78] sm:$0xff]  ;;  %v46_v1 = vld [vmem:[#allocation2 + $0x70] sm:$0xff]  ;;  %s150_s22 = smov [#allocation5]   ;;  %s80_s26 = sshll.u32 %s186_s3, 4  ;;  %s81_s26 = int_to_ptr.hbm [resolvable:$true] %s80_s26 }
   0x7   :  { %52 = vmatpush.msra.mxu0 %v47_v0  ;;  %v45_v2 = vld [vmem:[#allocation2 + $0x68] sm:$0xff]  ;;  %v44_v3 = vld [vmem:[#allocation2 + $0x60] sm:$0xff]  ;;  %v43_v4 = vld [vmem:[#allocation2 + $0x58] sm:$0xff]  ;;  %s78_s23 = sshll.u32 %s150_s22, 4  ;;  %s79_s23 = int_to_ptr.vmem [resolvable:$true] %s78_s23 }
   0x8   :  { %v42_v5 = vld [vmem:[#allocation2 + $0x50] sm:$0xff]  ;;  %v41_v6 = vld [vmem:[#allocation2 + $0x48] sm:$0xff]  ;;  %v40_v7 = vld [vmem:[#allocation2 + $0x40] sm:$0xff] }
   0x9   :  { %53 = vmatpush.msra.mxu0 %v46_v1  ;;  %v39_v8 = vld [vmem:[#allocation2 + $0x38] sm:$0xff]  ;;  %v38_v9 = vld [vmem:[#allocation2 + $0x30] sm:$0xff]  ;;  %v37_v10 = vld [vmem:[#allocation2 + $0x28] sm:$0xff] }
   0xa   :  { %v36_v11 = vld [vmem:[#allocation2 + $0x20] sm:$0xff]  ;;  %v35_v12 = vld [vmem:[#allocation2 + $0x18] sm:$0xff]  ;;  %v34_v13 = vld [vmem:[#allocation2 + $0x10] sm:$0xff] }
   0xb   :  { %54 = vmatpush.msra.mxu0 %v45_v2  ;;  %v33_v14 = vld [vmem:[#allocation2 + $0x8] sm:$0xff]  ;;  %v32_v15 = vld [vmem:[#allocation2] sm:$0xff] }
   0xc   :  { %v31_v16 = vld [vmem:[%s183_s0] sm:$0xff] }
   0xd   :  { %55 = vmatpush.msra.mxu0 %v44_v3  ;;  %v94_v17 = vld [vmem:[%s185_s2] ss:$0 sm:$0xff] }
   0xf   :  { %56 = vmatpush.msra.mxu0 %v43_v4 }
  0x11   :  { %57 = vmatpush.msra.mxu0 %v42_v5 }
  0x13   :  { %58 = vmatpush.msra.mxu0 %v41_v6 }
  0x15   :  { %59 = vmatpush.msra.mxu0 %v40_v7 }
  0x17   :  { %60 = vmatpush.msra.mxu0 %v39_v8 }
  0x19   :  { %61 = vmatpush.msra.mxu0 %v38_v9 }
  0x1b   :  { %62 = vmatpush.msra.mxu0 %v37_v10 }
  0x1d   :  { %63 = vmatpush.msra.mxu0 %v36_v11 }
  0x1f   :  { %64 = vmatpush.msra.mxu0 %v35_v12 }
  0x21   :  { %65 = vmatpush.msra.mxu0 %v34_v13 }
  0x23   :  { %66 = vmatpush.msra.mxu0 %v33_v14 }
  0x25   :  { %67 = vmatpush.msra.mxu0 %v32_v15 }
  0x26   :  { %68 = vmatmul.f32.vlgmr.msra.gmra.mxu0 %v31_v16 }
  0xa3   :  { %v69_v18 = vpop.f32.mrf.mxu0 }
  0xa4   :  { %v70_v19 = vadd.f32 %v94_v17, %v69_v18 }
  0xa6   :  { %72 = vst [vmem:[#allocation5] sm:$0xff] %v70_v19 }
  0xa7   :  { %83 = dma.vmem_to_hbm [thread:$0]  %s79_s23, 128, %s81_s26, [#allocation4]  }
  0xa8   :  { %145 = dma.done.wait [#allocation4], 128  }
  0xa9   :  { %146 = vsyncadd [#allocation4], 4294967168 }
  0xaa   :  { %88 = vsyncpa [#allocation3], 1 }
  0xab   :  { %89 = vsyncpa [#allocation4], 1 }

</bundles_post_ra>
